<compile_context>
chip_gen: v7x
topology: tpu7x:2x2x1
jax: 0.10.0
libtpu: 0.0.40
codegen_flags: <defaults>
</compile_context>

<pallas_src>
import jax
import jax.numpy as jnp
from jax.experimental import pallas as pl
from jax.experimental.pallas import tpu as pltpu


def _round_up(a, m):
    return ((a + m - 1) // m) * m


def _largest_divisor_le(k, cap):
    """Largest divisor d of k with d <= cap (at least 1)."""
    best = 1
    d = 1
    while d * d <= k:
        if k % d == 0:
            for c in (d, k // d):
                if c <= cap and c > best:
                    best = c
        d += 1
    return best


# ----------------------------- Pallas kernel ------------------------------
def _conv1x1_add_relu_kernel(x_ref, wt_ref, b_ref, y_ref, o_ref):
    # x_ref : (NB, Cin,  TS)   activations, lanes = spatial
    # wt_ref: (Cout, Cin)      conv weight (PyTorch OI layout), VMEM-resident
    # b_ref : (Cout, 1)        bias (lane-broadcast), VMEM-resident
    # y_ref : (NB, Cout, TS)   residual
    # o_ref : (NB, Cout, TS)
    wt = wt_ref[...]
    bias = b_ref[...]
    nb, cin, _ = x_ref.shape
    cout = wt.shape[0]
    use_mxu = (cin >= 16) or (cout >= 32)
    for bi in range(nb):                       # static unroll over batch block
        x = x_ref[bi]                          # (Cin, TS)
        acc = bias + y_ref[bi]                 # (Cout, TS), bias lane-broadcast
        if use_mxu:
            # MXU is otherwise idle in this kernel -> contraction is free.
            acc = acc + jnp.dot(wt, x, preferred_element_type=jnp.float32)
        else:
            # Tiny contraction (K = Cin) on the VPU: Cin broadcast-FMAs.
            for ci in range(cin):
                acc = acc + wt[:, ci:ci + 1] * x[ci:ci + 1, :]
        o_ref[bi] = jnp.maximum(acc, 0.0).astype(o_ref.dtype)


def conv1x1_add_relu(x_ncs, wt, b, y_ncs, *, ts_cap=65536):
    """x_ncs: (N, Cin, HW) f32, wt: (Cout, Cin), b: (Cout, 1), y_ncs: (N, Cout, HW)."""
    n, cin, hw = x_ncs.shape
    cout = wt.shape[0]

    # ---- generation-aware VMEM budget -------------------------------------
    try:
        vmem_cap = int(pltpu.get_tpu_info().vmem_capacity_bytes)
    except Exception:
        vmem_cap = 64 << 20                    # conservative (v7x per-TC size)
    ws_budget = vmem_cap // 3                  # cap for double-buffered tiles
    vmem_limit = min((vmem_cap * 3) // 4, 96 << 20)

    # ---- spatial tiling: lanes = HW, pad at most to the next 128 ----------
    hw_pad = _round_up(hw, 128)
    k = hw_pad // 128
    per_lane_bytes = (cin + 2 * cout) * 4      # x + y + out bytes per lane
    lane_budget = max(128, (ws_budget // 2) // per_lane_bytes)
    ts = 128 * _largest_divisor_le(k, max(1, min(ts_cap, lane_budget) // 128))
    spatial_tiles = hw_pad // ts

    # v7x megacore: keep >= 2 parallel grid steps when possible.
    if n * spatial_tiles < 2 and k >= 2:
        ts = 128 * _largest_divisor_le(k, k // 2)
        spatial_tiles = hw_pad // ts

    # ---- batch blocking: amortize per-step overhead when tiles are small --
    per_batch_tile = per_lane_bytes * ts
    nb = 1
    for cand in range(n, 0, -1):
        if n % cand:
            continue
        if 2 * cand * per_batch_tile > ws_budget:
            continue
        if (n // cand) * spatial_tiles < 2 and n * spatial_tiles >= 2:
            continue                           # don't collapse grid below 2 steps
        nb = cand
        break

    # ---- pad (<=127 lanes) only when HW is not lane-aligned ----------------
    padded = hw_pad != hw
    if padded:
        pad = ((0, 0), (0, 0), (0, hw_pad - hw))
        x_ncs = jnp.pad(x_ncs, pad)
        y_ncs = jnp.pad(y_ncs, pad)

    grid = (n // nb, spatial_tiles)

    out = pl.pallas_call(
        _conv1x1_add_relu_kernel,
        out_shape=jax.ShapeDtypeStruct((n, cout, hw_pad), y_ncs.dtype),
        grid_spec=pltpu.PrefetchScalarGridSpec(
            num_scalar_prefetch=0,
            grid=grid,
            in_specs=[
                pl.BlockSpec((nb, cin, ts), lambda b_, s: (b_, 0, s)),    # x
                pl.BlockSpec((cout, cin), lambda b_, s: (0, 0)),          # W (resident)
                pl.BlockSpec((cout, 1), lambda b_, s: (0, 0)),            # bias (resident)
                pl.BlockSpec((nb, cout, ts), lambda b_, s: (b_, 0, s)),   # residual y
            ],
            out_specs=pl.BlockSpec((nb, cout, ts), lambda b_, s: (b_, 0, s)),
        ),
        compiler_params=pltpu.CompilerParams(
            dimension_semantics=("parallel", "parallel"),
            vmem_limit_bytes=vmem_limit,
        ),
        # Reuse y's HBM buffer for the output (a true donation when no padding
        # copy was needed; with padding it aliases the temporary copy).
        input_output_aliases={3: 0},
    )(x_ncs, wt, b, y_ncs)

    if padded:
        out = out[:, :, :hw]
    return out


# ------------------------- inner two-input model --------------------------
def make_inner_model(key, cin, cout):
    kw, kb = jax.random.split(key)
    wt = jax.random.normal(kw, (cout, cin), jnp.float32) * 0.1   # conv weight (Cout, Cin)
    b = jax.random.normal(kb, (cout, 1), jnp.float32) * 0.1

    def model(x_nchw, y_nchw):
        n, c, h, w = x_nchw.shape
        # Free reshapes only (stay in NCHW; lanes = H*W).
        x_flat = x_nchw.reshape(n, c, h * w)
        y_flat = y_nchw.reshape(n, cout, h * w)
        o_flat = conv1x1_add_relu(x_flat, wt, b, y_flat)
        return o_flat.reshape(n, cout, h, w)

    return model, (wt, b)


# ------------------- SelfContainedModelP2 equivalent ----------------------
class SelfContainedModelP2:
    """JAX analogue: bundles model + its two inputs; forward() takes no args."""

    def __init__(self, model, data):
        self.model = model
        self.data = data

    def forward(self):
        return self.model(self.data[0], self.data[1])


# TODO(synk): torch.utils.bundled_inputs packaging / arbitrary wrapped models
# have no Pallas equivalent; a concrete conv1x1 + residual + ReLU model is used.


if __name__ == "__main__":
    # Small shapes consistent with a two-input conv-style model.
    N, Cin, Cout, H, W = 2, 4, 8, 16, 16   # H*W = 256 lanes (full-lane tiles)

    root = jax.random.PRNGKey(0)
    k_model, kx, ky = jax.random.split(root, 3)

    inner_model, (wt, b) = make_inner_model(k_model, Cin, Cout)

    x = jax.random.normal(kx, (N, Cin, H, W), jnp.float32)
    y = jax.random.normal(ky, (N, Cout, H, W), jnp.float32)

    wrapped = SelfContainedModelP2(inner_model, (x, y))
    out = wrapped.forward()
    out = jax.block_until_ready(out)

    # Pure-JAX reference for correctness (1x1 conv in NCHW = channel matmul).
    ref = jnp.maximum(
        jnp.einsum("oc,nchw->nohw", wt, x) + b.reshape(1, Cout, 1, 1) + y, 0.0
    )

    assert out.shape == (N, Cout, H, W)
    assert jnp.allclose(out, ref, atol=1e-5, rtol=1e-5)
    print("KERNEL_OK")
</pallas_src>

<mosaic_0001>
module attributes {stable_mosaic.version = 11 : i64} {
  func.func @_conv1x1_add_relu_kernel(%arg0: i32, %arg1: i32, %arg2: memref<1x4x256xf32, #tpu.memory_space<vmem>>, %arg3: memref<8x4xf32, #tpu.memory_space<vmem>>, %arg4: memref<8x1xf32, #tpu.memory_space<vmem>>, %arg5: memref<1x8x256xf32, #tpu.memory_space<vmem>>, %arg6: memref<1x8x256xf32, #tpu.memory_space<vmem>>) attributes {dimension_semantics = [#tpu.dimension_semantics<parallel>, #tpu.dimension_semantics<parallel>], iteration_bounds = array<i64: 2, 1>, scalar_prefetch = 0 : i64, scratch_operands = 0 : i64, tpu.core_type = #tpu.core_type<tc>, window_params = [{transform_indices = @transform_0, window_bounds = array<i64: 1, 4, 256>}, {pipeline_mode = #tpu.pipeline_mode<synchronous>, transform_indices = @transform_1, window_bounds = array<i64: 8, 4>}, {pipeline_mode = #tpu.pipeline_mode<synchronous>, transform_indices = @transform_2, window_bounds = array<i64: 8, 1>}, {transform_indices = @transform_3, window_bounds = array<i64: 1, 8, 256>}, {transform_indices = @transform_4, window_bounds = array<i64: 1, 8, 256>}]} {
    %c0 = arith.constant 0 : index
    %c0_0 = arith.constant 0 : index
    %0 = vector.load %arg3[%c0, %c0_0] : memref<8x4xf32, #tpu.memory_space<vmem>>, vector<8x4xf32>
    %c0_1 = arith.constant 0 : index
    %c0_2 = arith.constant 0 : index
    %1 = vector.load %arg4[%c0_1, %c0_2] : memref<8x1xf32, #tpu.memory_space<vmem>>, vector<8x1xf32>
    %c0_3 = arith.constant 0 : index
    %c0_4 = arith.constant 0 : index
    %c0_5 = arith.constant 0 : index
    %2 = vector.load %arg2[%c0_3, %c0_4, %c0_5] : memref<1x4x256xf32, #tpu.memory_space<vmem>>, vector<1x4x256xf32>
    %3 = vector.shape_cast %2 : vector<1x4x256xf32> to vector<4x256xf32>
    %c0_6 = arith.constant 0 : index
    %c0_7 = arith.constant 0 : index
    %c0_8 = arith.constant 0 : index
    %4 = vector.load %arg5[%c0_6, %c0_7, %c0_8] : memref<1x8x256xf32, #tpu.memory_space<vmem>>, vector<1x8x256xf32>
    %5 = vector.shape_cast %4 : vector<1x8x256xf32> to vector<8x256xf32>
    %6 = vector.broadcast %1 : vector<8x1xf32> to vector<8x256xf32>
    %7 = arith.addf %6, %5 : vector<8x256xf32>
    %8 = vector.extract_strided_slice %0 {offsets = [0, 0], sizes = [8, 1], strides = [1, 1]} : vector<8x4xf32> to vector<8x1xf32>
    %9 = vector.extract_strided_slice %3 {offsets = [0, 0], sizes = [1, 256], strides = [1, 1]} : vector<4x256xf32> to vector<1x256xf32>
    %10 = vector.broadcast %8 : vector<8x1xf32> to vector<8x256xf32>
    %11 = vector.broadcast %9 : vector<1x256xf32> to vector<8x256xf32>
    %12 = arith.mulf %10, %11 : vector<8x256xf32>
    %13 = arith.addf %7, %12 : vector<8x256xf32>
    %14 = vector.extract_strided_slice %0 {offsets = [0, 1], sizes = [8, 1], strides = [1, 1]} : vector<8x4xf32> to vector<8x1xf32>
    %15 = vector.extract_strided_slice %3 {offsets = [1, 0], sizes = [1, 256], strides = [1, 1]} : vector<4x256xf32> to vector<1x256xf32>
    %16 = vector.broadcast %14 : vector<8x1xf32> to vector<8x256xf32>
    %17 = vector.broadcast %15 : vector<1x256xf32> to vector<8x256xf32>
    %18 = arith.mulf %16, %17 : vector<8x256xf32>
    %19 = arith.addf %13, %18 : vector<8x256xf32>
    %20 = vector.extract_strided_slice %0 {offsets = [0, 2], sizes = [8, 1], strides = [1, 1]} : vector<8x4xf32> to vector<8x1xf32>
    %21 = vector.extract_strided_slice %3 {offsets = [2, 0], sizes = [1, 256], strides = [1, 1]} : vector<4x256xf32> to vector<1x256xf32>
    %22 = vector.broadcast %20 : vector<8x1xf32> to vector<8x256xf32>
    %23 = vector.broadcast %21 : vector<1x256xf32> to vector<8x256xf32>
    %24 = arith.mulf %22, %23 : vector<8x256xf32>
    %25 = arith.addf %19, %24 : vector<8x256xf32>
    %26 = vector.extract_strided_slice %0 {offsets = [0, 3], sizes = [8, 1], strides = [1, 1]} : vector<8x4xf32> to vector<8x1xf32>
    %27 = vector.extract_strided_slice %3 {offsets = [3, 0], sizes = [1, 256], strides = [1, 1]} : vector<4x256xf32> to vector<1x256xf32>
    %28 = vector.broadcast %26 : vector<8x1xf32> to vector<8x256xf32>
    %29 = vector.broadcast %27 : vector<1x256xf32> to vector<8x256xf32>
    %30 = arith.mulf %28, %29 : vector<8x256xf32>
    %31 = arith.addf %25, %30 : vector<8x256xf32>
    %cst = arith.constant 0.000000e+00 : f32
    %32 = vector.broadcast %cst : f32 to vector<8x256xf32>
    %33 = arith.maximumf %31, %32 : vector<8x256xf32>
    %c0_9 = arith.constant 0 : index
    %c0_10 = arith.constant 0 : index
    %c0_11 = arith.constant 0 : index
    %34 = vector.load %arg6[%c0_9, %c0_10, %c0_11] : memref<1x8x256xf32, #tpu.memory_space<vmem>>, vector<1x8x256xf32>
    %35 = vector.shape_cast %34 : vector<1x8x256xf32> to vector<8x256xf32>
    %36 = vector.shape_cast %33 : vector<8x256xf32> to vector<1x8x256xf32>
    tpu.vector_store %arg6[%c0_9, %c0_10, %c0_11], %36 {strides = array<i32>} : memref<1x8x256xf32, #tpu.memory_space<vmem>>, vector<1x8x256xf32>,
    return
  }
  func.func @transform_0(%arg0: i32, %arg1: i32) -> (i32, i32, i32) {
    %c0_i32 = arith.constant 0 : i32
    %c0_i32_0 = arith.constant 0 : i32
    return %arg0, %c0_i32, %arg1 : i32, i32, i32
  }
  func.func @transform_1(%arg0: i32, %arg1: i32) -> (i32, i32) {
    %c0_i32 = arith.constant 0 : i32
    %c0_i32_0 = arith.constant 0 : i32
    %c0_i32_1 = arith.constant 0 : i32
    return %c0_i32, %c0_i32_0 : i32, i32
  }
  func.func @transform_2(%arg0: i32, %arg1: i32) -> (i32, i32) {
    %c0_i32 = arith.constant 0 : i32
    %c0_i32_0 = arith.constant 0 : i32
    %c0_i32_1 = arith.constant 0 : i32
    return %c0_i32, %c0_i32_0 : i32, i32
  }
  func.func @transform_3(%arg0: i32, %arg1: i32) -> (i32, i32, i32) {
    %c0_i32 = arith.constant 0 : i32
    %c0_i32_0 = arith.constant 0 : i32
    return %arg0, %c0_i32, %arg1 : i32, i32, i32
  }
  func.func @transform_4(%arg0: i32, %arg1: i32) -> (i32, i32, i32) {
    %c0_i32 = arith.constant 0 : i32
    %c0_i32_0 = arith.constant 0 : i32
    return %arg0, %c0_i32, %arg1 : i32, i32, i32
  }
}

</mosaic_0001>

<bundles_post_ra>
// kernel: tpu_custom_call.1
= control target key start
LH: loop header
LB: loop body
LE: loop exit
PB: predicated region body
PF: predicated region fallthrough
CT: control target
= control target key end

     0   :  { %9 = vsyncpa [#allocation3], 0  ;;  %s937_s0 = inlined_call_operand.vmem [shape: f32[2,4,256], index: 0, kind: input, shape index: {}]   ;;  %s938_s1 = inlined_call_operand.vmem [shape: f32[8,4], index: 1, kind: input, shape index: {}]   ;;  %s939_s2 = inlined_call_operand.vmem [shape: f32[8,1], index: 2, kind: input, shape index: {}]   ;;  %s940_s3 = inlined_call_operand.hbm [shape: f32[2,8,256], index: 3, kind: input, shape index: {}, may-alias: {3,4}]   ;;  %s941_s4 = inlined_call_operand.hbm [shape: f32[2,8,256], index: 4, kind: output, shape index: {}, may-alias: {3,4}]  }
   0x1   :  { %11 = vsyncpa [#allocation3 + $0x1], 0 }
   0x2   :  { %12 = vsyncpa [#allocation4], 0 }
   0x3   :  { %14 = vsyncpa [#allocation4 + $0x1], 0  ;;  %s746_s15 = smov 0   ;;  %s748_s16 = smov 0  }
   0x4   :  { %s750_s17 = smov 0   ;;  %s752_s18 = smov 0  }
   0x5   :  { %s754_s19 = smov 0   ;;  %s756_s20 = smov 0  }
   0x6 LB: > { %s511_s21 = sadd.s32 4294967295, %s713_s20   ;;  %s512_s22 = sadd.s32 4294967294, %s713_s20   ;;  %s713_s20 = sphi %s756_s20, %s20_s20   ;;  %s709_s19 = sphi %s754_s19, %s957_s19   ;;  %s705_s18 = sphi %s752_s18, %s956_s18   ;;  %s701_s17 = sphi %s750_s17, %s955_s17   ;;  %s697_s16 = sphi %s748_s16, %s954_s16   ;;  %s693_s15 = sphi %s746_s15, %s953_s15  }
   0x7   : > { %s32_s23 = sadd.s32 1, %s709_s19  ;;  %s111_s24 = sadd.s32 1, %s701_s17 }
   0x8   : > { %p34_p0 = scmp.ge.s32.totalorder %s32_s23, 2  ;;  %p118_p1 = scmp.ne.s32.totalorder %s701_s17, %s697_s16 }
   0x9   : > { %p119_p2 = scmp.eq.s32.totalorder %s713_s20, 0  ;;  %p124_p3 = scmp.ne.s32.totalorder %s697_s16, %s693_s15 }
   0xa   : > { %s959_s23 = smov (%p34_p0, %s32_s23), 0  ;;  %p125_p5 = scmp.eq.s32.totalorder %s511_s21, 0 }
   0xb   : > { %p787_p4 = por %p119_p2, %p118_p1  ;;  %s106_s26 = ssub.s32 %s709_s19, %s959_s23 }
   0xc   : > { %p150_p6 = scmp.eq.s32.totalorder %s511_s21, 1  ;;  %p109_p7 = scmp.eq.s32.totalorder %s106_s26, 0 }
   0xd   : > { %p793_p8 = por %p125_p5, %p124_p3  ;;  %p156_p10 = scmp.eq.s32.totalorder %s512_s22, 1 }
   0xe   : > { %p797_p9 = por %p150_p6, %p118_p1  ;;  %p543_p13 = scmp.lt.s32.totalorder %s713_s20, 2 }
   0xf   : > { %s802_s29 = scalar_select %p109_p7, %s701_s17, %s111_s24  }
  0x10   : > { %s945_s28 = scalar_select %p797_p9, 1, 0 }
  0x11   : > { %p804_p11 = por %p156_p10, %p124_p3  ;;  %s195_s5 = sand.u32 1, %s701_s17  }
  0x12   : > { %s515_s6 = sshll.u32 %s195_s5, 4  ;;  %s528_s7 = sshll.u32 %s709_s19, 8 }
  0x13   : > { %s946_s30 = scalar_select %p804_p11, 1, 0 }
  0x14   : > { %s815_s10 = scalar_lea.hbm %s940_s3, %s528_s7  ;;  %s199_s11 = scalar_lea.vmem [#allocation2], %s515_s6 }
  0x15   : > { %s209_s12 = sshll.u32 %s199_s11, 4  ;;  %p821_p0 = pnand %p543_p13, %p787_p4  ;;  %s817_s12 = int_to_ptr.vmem [resolvable:$true] %s209_s12 }
  0x16   : > { %s196_s14 = scalar_lea.sflag [#allocation3], %s195_s5  ;;  %s601_s21 = scalar_lea.hbm %s815_s10, 256 }
  0x17   : > { %p602_p3 = scmp.ne.s32.totalorder %s815_s10, %s601_s21  ;;  %p603_p5 = pneg %p821_p0 }
  0x18   : > { %s606_s25 = scalar_lea.hbm %s940_s3, 512  ;;  %p607_p4 = scmp.lt.u32.totalorder %s815_s10, %s940_s3 }
  0x19   : > { %p604_p6 = pnand %p603_p5, %p602_p3  ;;  %p608_p10 = scmp.lt.u32.totalorder %s606_s25, %s601_s21 }
  0x1a   : > { %p610_p12 = scmp.lt.u32.totalorder %s601_s21, %s815_s10 }
  0x1b   : > { %p605_p7 = pneg %p604_p6  ;;  %p609_p13 = por %p608_p10, %p607_p4 }
  0x1d   : > { %p611_p1 = por %p610_p12, %p609_p13 }
  0x1f   : > { %p612_p2 = pnand %p611_p1, %p605_p7 }
  0x21   : > { %615 = shalt.err (!%p612_p2)
}
  0x22   : > { %s616_s5 = scalar_lea.vmem %s817_s12, 256  ;;  %s715_s7 = smov [#allocation2]  }
  0x23   : > { %p617_p3 = scmp.ne.s32.totalorder %s817_s12, %s616_s5  ;;  %s621_s8 = sshll.u32 %s715_s7, 4  ;;  %s622_s8 = int_to_ptr.vmem [resolvable:$false] %s621_s8 }
  0x24   : > { %s623_s9 = scalar_lea.vmem %s622_s8, 512  ;;  %p624_p9 = scmp.lt.s32.totalorder %s817_s12, %s622_s8 }
  0x25   : > { %p619_p6 = pnand %p617_p3, %p603_p5  ;;  %p625_p4 = scmp.lt.s32.totalorder %s623_s9, %s616_s5 }
  0x27   : > { %p620_p11 = pneg %p619_p6  ;;  %p626_p10 = por %p625_p4, %p624_p9 }
  0x29   : > { %p627_p12 = pnand %p626_p10, %p620_p11 }
  0x2b   : > { %630 = shalt.err (!%p627_p12)
}
  0x2c   : > { %538 = dma.hbm_to_vmem [thread:$0]  (!%p821_p0), %s815_s10, 256, %s817_s12, %s196_s14  }
  0x2d   : > { %p948_p1 = scmp.lt.s32.totalorder %s713_s20, 3  ;;  %p949_p2 = scmp.ge.s32.totalorder %s713_s20, 1 }
  0x2f   : > { %p215_p5 = pnand %p949_p2, %p948_p1 }
  0x30   : > { %s857_s11 = sand.u32 (!%p215_p5), 1, %s697_s16  }
  0x31   : > { %218 = sbr.rel (%p215_p5) target bundleno = 217 (0xd9), region = 36  ;;  %s519_s21 = sshll.u32 (!%p215_p5), %s857_s11, 4 }
  0x32   : > { %s221_s22 = scalar_lea.sflag (!%p215_p5), [#allocation3], %s857_s11  ;;  %s863_s13 = scalar_lea.vmem (!%p215_p5), [#allocation2], %s519_s21 }
  0x38   : > { %684 = dma.done.wait (%p793_p8), %s221_s22, 256  }
  0x39   : > { %686 = vsyncadd (%p793_p8), %s221_s22, 4294967040  ;;  %v716_v0 = vmov 0   ;;  %v717_v1 = vmov 1   ;;  %v271_v2 = vld [vmem:[%s939_s2] sm:$0xff]  ;;  %v718_v4 = vmov 2   ;;  %v719_v5 = vmov 3  }
  0x3a   : > { %597 = vset.pattern.permute.xlu0 %v716_v0  ;;  %598 = vset.pattern.permute.xlu1 %v717_v1  ;;  %v270_v3 = vld [vmem:[%s938_s1] sm:$0xff]  ;;  %p259_p8 = scmp.lt.s32.totalorder %s705_s18, 1  ;;  %v288_v6 = vlaneseq  ;;  %v274_v28 = vld [vmem:[%s863_s13 + $0x8] sm:$0xff]  ;;  %s530_s7 = sshll.u32 %s705_s18, 8 }
  0x3b   : > { %277 = vperm.xlu0 %597, %v271_v2   ;;  %311 = vperm.xlu1 %598, %v270_v3   ;;  %v273_v27 = vld [vmem:[%s863_s13] sm:$0xff]  ;;  %s257_s8 = scalar_lea.vmem [#allocation5], %s519_s21  ;;  %s888_s10 = scalar_lea.hbm %s941_s4, %s530_s7 }
  0x3c   : > { %s260_s27 = scalar_select %p259_p8, %s705_s18, 1  ;;  %v289_v7 = vshrl.u32 %v288_v6, 7 }
  0x3d   : > { %s409_s9 = sshll.u32 %s257_s8, 4  ;;  %s393_s18 = scalar_lea.sflag [#allocation4], %s857_s11  ;;  %s890_s9 = int_to_ptr.vmem [resolvable:$true] %s409_s9 }
  0x3e   : > { %s529_s25 = sshll.u32 %s260_s27, 3  ;;  %v290_v8 = vsub.s32 0, %v289_v7  ;;  %v294_v9 = vsub.s32 4, %v289_v7  ;;  %v316_v11 = vsub.s32 1, %v289_v7  ;;  %v320_v12 = vsub.s32 5, %v289_v7  ;;  %s631_s12 = scalar_lea.vmem %s890_s9, 256 }
  0x3f   : > { %284 = vperm.xlu0 %597, %v270_v3   ;;  %599 = vset.pattern.permute.xlu1 %v718_v4  ;;  %s266_s5 = scalar_lea.vmem %s937_s0, %s529_s25  ;;  %v342_v13 = vsub.s32 2, %v289_v7  ;;  %v346_v14 = vsub.s32 6, %v289_v7  ;;  %v368_v19 = vsub.s32 3, %v289_v7  ;;  %v372_v20 = vsub.s32 7, %v289_v7  ;;  %p632_p9 = scmp.ne.s32.totalorder %s890_s9, %s631_s12 }
  0x40   : > { %337 = vperm.xlu1 %599, %v270_v3   ;;  %v272_v10 = vld [vmem:[%s266_s5] sm:$0xff]  ;;  %p950_p11 = scmp.ne.s32.totalorder %s945_s28, 0  ;;  %s720_s21 = smov [#allocation5]  }
  0x41   : > { %v291_v15 = vrot.slane %v272_v10, %v290_v8  ;;  %v295_v16 = vrot.slane %v272_v10, %v294_v9  ;;  %v317_v17 = vrot.slane %v272_v10, %v316_v11  ;;  %v321_v18 = vrot.slane %v272_v10, %v320_v12  ;;  %s635_s14 = sshll.u32 %s720_s21, 4  ;;  %s636_s14 = int_to_ptr.vmem [resolvable:$false] %s635_s14 }
  0x42   : > { %v343_v21 = vrot.slane %v272_v10, %v342_v13  ;;  %v347_v22 = vrot.slane %v272_v10, %v346_v14  ;;  %v369_v31 = vrot.slane %v272_v10, %v368_v19  ;;  %v373_v32 = vrot.slane %v272_v10, %v372_v20  ;;  %p633_p0 = pnand %p632_p9, %p950_p11  ;;  %s637_s24 = scalar_lea.vmem %s636_s14, 512 }
  0x43   : > { %600 = vset.pattern.permute.xlu0 %v719_v5  ;;  %v301_v25 = vrot.slane %v291_v15, %v290_v8  ;;  %v305_v26 = vrot.slane %v295_v16, %v290_v8  ;;  %v327_v29 = vrot.slane %v317_v17, %v316_v11  ;;  %v331_v30 = vrot.slane %v321_v18, %v316_v11  ;;  %p638_p13 = scmp.lt.s32.totalorder %s890_s9, %s636_s14  ;;  %p639_p3 = scmp.lt.s32.totalorder %s637_s24, %s631_s12 }
  0x44   : > { %363 = vperm.xlu0 %600, %v270_v3   ;;  %v353_v33 = vrot.slane %v343_v21, %v342_v13  ;;  %v357_v34 = vrot.slane %v347_v22, %v342_v13  ;;  %v379_v43 = vrot.slane %v369_v31, %v368_v19  ;;  %v383_v44 = vrot.slane %v373_v32, %v368_v19  ;;  %p634_p7 = pneg %p633_p0 }
  0x45   : > { %p640_p6 = por %p639_p3, %p638_p13 }
  0x47   : > { %p641_p4 = pnand %p640_p6, %p634_p7 }
  0xba   : > { %v278_v23 = vpop.permute.xlu0 %277  ;;  %v312_v24 = vpop.permute.xlu1 %311 }
  0xbb   : > { %v280_v36 = vadd.f32 %v278_v23, %v273_v27  ;;  %v281_v37 = vadd.f32 %v278_v23, %v274_v28  ;;  %v332_v41 = vmul.f32 %v327_v29, %v312_v24  ;;  %v333_v42 = vmul.f32 %v331_v30, %v312_v24 }
  0xbe   : > { %v285_v35 = vpop.permute.xlu0 %284 }
  0xbf   : > { %v306_v38 = vmul.f32 %v301_v25, %v285_v35  ;;  %v307_v39 = vmul.f32 %v305_v26, %v285_v35  ;;  %v338_v40 = vpop.permute.xlu1 %337 }
  0xc0   : > { %v358_v47 = vmul.f32 %v353_v33, %v338_v40  ;;  %v359_v48 = vmul.f32 %v357_v34, %v338_v40 }
  0xc1   : > { %v308_v45 = vadd.f32 %v306_v38, %v280_v36  ;;  %v309_v46 = vadd.f32 %v307_v39, %v281_v37 }
  0xc3   : > { %v334_v49 = vadd.f32 %v332_v41, %v308_v45  ;;  %v335_v50 = vadd.f32 %v333_v42, %v309_v46  ;;  %v364_v51 = vpop.permute.xlu0 %363 }
  0xc4   : > { %v384_v52 = vmul.f32 %v379_v43, %v364_v51  ;;  %v385_v53 = vmul.f32 %v383_v44, %v364_v51 }
  0xc5   : > { %v360_v54 = vadd.f32 %v358_v47, %v334_v49  ;;  %v361_v55 = vadd.f32 %v359_v48, %v335_v50 }
  0xc7   : > { %v386_v56 = vadd.f32 %v384_v52, %v360_v54  ;;  %v387_v57 = vadd.f32 %v385_v53, %v361_v55 }
  0xc9   : > { %v388_v58 = vmax.f32 %v386_v56, 0.0  ;;  %v389_v59 = vmax.f32 %v387_v57, 0.0 }
  0xcb   : > { %390 = vst [vmem:[%s257_s8] sm:$0xff] %v388_v58  ;;  %391 = vst [vmem:[%s257_s8 + $0x8] sm:$0xff] %v389_v59 }
  0xcc   : > { %644 = shalt.err (!%p641_p4)
}
  0xcd   : > { %s645_s11 = scalar_lea.hbm %s888_s10, 256  ;;  %s649_s26 = scalar_lea.hbm %s941_s4, 512 }
  0xce   : > { %p646_p10 = scmp.ne.s32.totalorder %s888_s10, %s645_s11  ;;  %p650_p2 = scmp.lt.u32.totalorder %s888_s10, %s941_s4 }
  0xcf   : > { %p651_p5 = scmp.lt.u32.totalorder %s649_s26, %s645_s11  ;;  %p653_p9 = scmp.lt.u32.totalorder %s645_s11, %s888_s10 }
  0xd0   : > { %p647_p12 = pnand %p646_p10, %p950_p11 }
  0xd1   : > { %p652_p8 = por %p651_p5, %p650_p2 }
  0xd2   : > { %p648_p1 = pneg %p647_p12 }
  0xd3   : > { %p654_p0 = por %p653_p9, %p652_p8 }
  0xd5   : > { %p655_p7 = pnand %p654_p0, %p648_p1 }
  0xd7   : > { %658 = shalt.err (!%p655_p7)
}
  0xd8   : > { %533 = dma.vmem_to_hbm [thread:$0]  (%p950_p11), %s890_s9, 256, %s888_s10, %s393_s18  }
  0xd9 PF: > { %s421_s7 = sand.u32 1, %s693_s15   ;;  %p951_p13 = scmp.ne.s32.totalorder %s946_s30, 0 }
  0xda   : > { %p952_p3 = scmp.ge.s32.totalorder %s713_s20, 2  ;;  %s422_s8 = scalar_lea.sflag [#allocation4], %s421_s7 }
  0xdc   : > { %p540_p6 = pnand %p952_p3, %p951_p13 }
  0xde   : > { %688 = dma.done.wait (!%p540_p6), %s422_s8, 256  }
  0xdf   : > { %690 = vsyncadd (!%p540_p6), %s422_s8, 4294967040  ;;  %s20_s20 = sadd.s32 1, %s713_s20   ;;  %s953_s15 = smov %s697_s16 }
  0xe0   : > { %p17_p4 = scmp.ge.s32.totalorder %s20_s20, 4   ;;  %s954_s16 = smov %s701_s17 }
  0xe1   : > { %s955_s17 = smov %s802_s29  ;;  %s956_s18 = smov %s709_s19 }
  0xe2   : > { %s957_s19 = smov %s959_s23  ;;  %19 = sbr.rel (!%p17_p4) target bundleno = 6 (0x6), region = 84 }
  0xe9   :  { %427 = vsyncpa [#allocation3], 1 }
  0xea   :  { %429 = vsyncpa [#allocation3 + $0x1], 1 }
  0xeb   :  { %430 = vsyncpa [#allocation4], 1 }
  0xec   :  { %432 = vsyncpa [#allocation4 + $0x1], 1 }

</bundles_post_ra>
